<compile_context>
chip_gen: v5e
topology: v5e:2x2
jax: 0.10.0
libtpu: 0.0.40
codegen_flags: <defaults>
</compile_context>

<pallas_src>
import jax
import jax.numpy as jnp
from jax.experimental import pallas as pl
from jax.experimental.pallas import tpu as pltpu


def _self_attention_kernel(x_ref, wcat_ref, bcat_ref, wv_ref, bv_ref, w_ref,
                           out_ref, f_scr, g_scr, h_scr):
    q_idx = pl.program_id(1)
    tq = out_ref.shape[1]            # query tile size
    np_tok = g_scr.shape[0]          # Np = (H//2)*(W//2)
    cq = g_scr.shape[1]              # C // 8

    # ---- per-batch phase (first query tile only): fused projections -------
    @pl.when(q_idx == 0)
    def _():
        x_all = x_ref[0].astype(jnp.bfloat16)                    # (N, C)
        proj = jnp.dot(x_all, wcat_ref[...],
                       preferred_element_type=jnp.float32)       # (N, 3C/4)
        proj = proj + bcat_ref[...]
        # f branch: all N tokens.
        f_scr[...] = proj[:, :cq].astype(jnp.bfloat16)
        # g / h branches: 2x2 max-pool AFTER the conv == elementwise max over
        # the 4 pool-window slices (rows k*Np .. (k+1)*Np in grouped order).
        gh = proj[:, cq:]                                        # (N, Cq+Ch)
        pooled = gh[0:np_tok]
        for k in range(1, 4):                                    # static unroll
            pooled = jnp.maximum(pooled, gh[k * np_tok:(k + 1) * np_tok])
        g_scr[...] = pooled[:, :cq].astype(jnp.bfloat16)         # (Np, Cq)
        h_scr[...] = pooled[:, cq:].astype(jnp.bfloat16)         # (Np, Ch)

    # ---- per-query-tile phase: attention + output projection + residual ---
    start = pl.multiple_of(q_idx * tq, tq)
    f_q = f_scr[pl.ds(start, tq), :]                             # (TQ, Cq) bf16
    s = jax.lax.dot_general(f_q, g_scr[...], (((1,), (1,)), ((), ())),
                            preferred_element_type=jnp.float32)  # (TQ, Np) f32
    s = s - jnp.max(s, axis=-1, keepdims=True)
    p = jnp.exp(s)
    inv = pl.reciprocal(jnp.sum(p, axis=-1, keepdims=True), approx=True)
    attn = (p * inv).astype(jnp.bfloat16)

    v = jnp.dot(attn, h_scr[...], preferred_element_type=jnp.float32)   # (TQ, Ch)
    o = jnp.dot(v.astype(jnp.bfloat16), wv_ref[...],
                preferred_element_type=jnp.float32) + bv_ref[...]       # (TQ, C)

    x_q = x_ref[0, pl.ds(start, tq), :]                          # residual (f32)
    out_ref[0] = (w_ref[0] * o + x_q).astype(out_ref.dtype)


def self_attention(x, params, *, tq=128):
    """x: (B, C, H, W) NCHW float32 -> (B, C, H, W)."""
    Wf, bf, Wg, bg, Wh, bh, Wv, bv, w = params
    B, C, H, W = x.shape
    assert H % 2 == 0 and W % 2 == 0 and C % 8 == 0
    N = H * W
    Hp, Wp = H // 2, W // 2
    Np = Hp * Wp
    Cq = Wf.shape[1]                 # C // 8
    Ch = Wh.shape[1]                 # C // 2
    Ccat = 2 * Cq + Ch

    tq = min(tq, N)
    assert N % tq == 0 and tq % 8 == 0

    # Single channels-last relayout into grouped token order (the kernel's
    # only activation input -- no duplicate x_flat copy / double DMA).
    xn = jnp.transpose(x, (0, 2, 3, 1))                          # (B, H, W, C)
    x_grp = (xn.reshape(B, Hp, 2, Wp, 2, C)
               .transpose(0, 2, 4, 1, 3, 5)
               .reshape(B, N, C))                                # (B, N, C)

    # Fused projection weights ([f | g | h]); matmul operands in bf16.
    w_cat = jnp.concatenate([Wf, Wg, Wh], axis=1).astype(jnp.bfloat16)
    b_cat = jnp.concatenate([bf, bg, bh], axis=1)                # f32 (1, Ccat)
    wv_b = Wv.astype(jnp.bfloat16)

    out_grp = pl.pallas_call(
        _self_attention_kernel,
        out_shape=jax.ShapeDtypeStruct((B, N, C), x.dtype),
        grid_spec=pltpu.PrefetchScalarGridSpec(
            num_scalar_prefetch=0,
            grid=(B, N // tq),
            in_specs=[
                # full token set per batch; block index constant along q so it
                # is fetched once per batch element.
                pl.BlockSpec((1, N, C), lambda b, q: (b, 0, 0)),
                pl.BlockSpec((C, Ccat), lambda b, q: (0, 0)),
                pl.BlockSpec((1, Ccat), lambda b, q: (0, 0)),
                pl.BlockSpec((Ch, C), lambda b, q: (0, 0)),
                pl.BlockSpec((1, C), lambda b, q: (0, 0)),
                pl.BlockSpec(memory_space=pltpu.MemorySpace.SMEM),  # gate w
            ],
            out_specs=pl.BlockSpec((1, tq, C), lambda b, q: (b, q, 0)),
            scratch_shapes=[
                pltpu.VMEM((N, Cq), jnp.bfloat16),    # f for all tokens
                pltpu.VMEM((Np, Cq), jnp.bfloat16),   # pooled g
                pltpu.VMEM((Np, Ch), jnp.bfloat16),   # pooled h
            ],
        ),
        compiler_params=pltpu.CompilerParams(
            dimension_semantics=("parallel", "arbitrary"),
            vmem_limit_bytes=64 * 1024 * 1024,
        ),
    )(x_grp, w_cat, b_cat, wv_b, bv, w)

    # Un-permute grouped token order back to (B, C, H, W).
    out = (out_grp.reshape(B, 2, 2, Hp, Wp, C)
                  .transpose(0, 3, 1, 4, 2, 5)
                  .reshape(B, H, W, C))
    return jnp.transpose(out, (0, 3, 1, 2))


def reference(x, params):
    """Pure-JAX f32 reference of the PyTorch forward (correctness check)."""
    Wf, bf, Wg, bg, Wh, bh, Wv, bv, w = params
    B, C, H, W = x.shape
    xn = jnp.transpose(x, (0, 2, 3, 1))                          # (B, H, W, C)
    x_flat = xn.reshape(B, H * W, C)

    f = x_flat @ Wf + bf                                         # (B, N, C//8)

    def conv_pool(Wm, bm):
        y = xn @ Wm + bm                                         # (B, H, W, Co)
        y = y.reshape(B, H // 2, 2, W // 2, 2, -1).max(axis=(2, 4))
        return y.reshape(B, (H // 2) * (W // 2), -1)             # (B, Np, Co)

    g = conv_pool(Wg, bg)
    h = conv_pool(Wh, bh)

    s = jnp.einsum('bnc,bmc->bnm', f, g)
    attn = jax.nn.softmax(s, axis=-1)
    v = jnp.einsum('bnm,bmc->bnc', attn, h)
    o = v @ Wv + bv
    out = w * o + x_flat
    return jnp.transpose(out.reshape(B, H, W, C), (0, 3, 1, 2))


if __name__ == "__main__":
    key = jax.random.PRNGKey(0)
    B, C, H, W = 2, 32, 16, 16
    ks = jax.random.split(key, 9)
    scale = 0.1

    Wf = jax.random.normal(ks[0], (C, C // 8), jnp.float32) * scale
    bf = jax.random.normal(ks[1], (1, C // 8), jnp.float32) * scale
    Wg = jax.random.normal(ks[2], (C, C // 8), jnp.float32) * scale
    bg = jax.random.normal(ks[3], (1, C // 8), jnp.float32) * scale
    Wh = jax.random.normal(ks[4], (C, C // 2), jnp.float32) * scale
    bh = jax.random.normal(ks[5], (1, C // 2), jnp.float32) * scale
    Wv = jax.random.normal(ks[6], (C // 2, C), jnp.float32) * scale
    bv = jax.random.normal(ks[7], (1, C), jnp.float32) * scale
    # PyTorch init is torch.zeros(1); use a deterministic nonzero gate so the
    # attention path actually contributes to the checked output.
    w = jnp.array([0.5], jnp.float32)

    x = jax.random.normal(ks[8], (B, C, H, W), jnp.float32)
    params = (Wf, bf, Wg, bg, Wh, bh, Wv, bv, w)

    out = self_attention(x, params, tq=128)
    out = jax.block_until_ready(out)

    ref = reference(x, params)
    assert out.shape == x.shape
    # bf16 matmul operands + approx-reciprocal softmax => tolerance above f32.
    if not jnp.allclose(out, ref, atol=2e-2, rtol=2e-2):
        max_err = jnp.max(jnp.abs(out - ref))
        raise AssertionError(
            f"Pallas kernel mismatch vs JAX reference (max abs err {max_err})")
    print("KERNEL_OK")
</pallas_src>

<mosaic_0001>
module attributes {stable_mosaic.version = 11 : i64} {
  func.func @_self_attention_kernel(%arg0: i32, %arg1: i32, %arg2: memref<1x256x32xf32, #tpu.memory_space<vmem>>, %arg3: memref<32x24xbf16, #tpu.memory_space<vmem>>, %arg4: memref<1x24xf32, #tpu.memory_space<vmem>>, %arg5: memref<16x32xbf16, #tpu.memory_space<vmem>>, %arg6: memref<1x32xf32, #tpu.memory_space<vmem>>, %arg7: memref<1xf32, #tpu.memory_space<smem>>, %arg8: memref<1x128x32xf32, #tpu.memory_space<vmem>>, %arg9: memref<256x4xbf16, #tpu.memory_space<vmem>>, %arg10: memref<64x4xbf16, #tpu.memory_space<vmem>>, %arg11: memref<64x16xbf16, #tpu.memory_space<vmem>>) attributes {dimension_semantics = [#tpu.dimension_semantics<parallel>, #tpu.dimension_semantics<arbitrary>], iteration_bounds = array<i64: 2, 2>, scalar_prefetch = 0 : i64, scratch_operands = 3 : i64, tpu.core_type = #tpu.core_type<tc>, window_params = [{transform_indices = @transform_0, window_bounds = array<i64: 1, 256, 32>}, {pipeline_mode = #tpu.pipeline_mode<synchronous>, transform_indices = @transform_1, window_bounds = array<i64: 32, 24>}, {pipeline_mode = #tpu.pipeline_mode<synchronous>, transform_indices = @transform_2, window_bounds = array<i64: 1, 24>}, {pipeline_mode = #tpu.pipeline_mode<synchronous>, transform_indices = @transform_3, window_bounds = array<i64: 16, 32>}, {pipeline_mode = #tpu.pipeline_mode<synchronous>, transform_indices = @transform_4, window_bounds = array<i64: 1, 32>}, {transform_indices = @transform_5, window_bounds = array<i64: 1>}, {transform_indices = @transform_6, window_bounds = array<i64: 1, 128, 32>}]} {
    %c0_i32 = arith.constant 0 : i32
    %0 = arith.cmpi eq, %arg1, %c0_i32 : i32
    %1 = arith.extui %0 : i1 to i32
    %c0_i32_0 = arith.constant 0 : i32
    %2 = arith.cmpi ne, %1, %c0_i32_0 : i32
    scf.if %2 {
      %c0_19 = arith.constant 0 : index
      %c0_20 = arith.constant 0 : index
      %c0_21 = arith.constant 0 : index
      %38 = vector.load %arg2[%c0_19, %c0_20, %c0_21] : memref<1x256x32xf32, #tpu.memory_space<vmem>>, vector<1x256x32xf32>
      %39 = vector.shape_cast %38 : vector<1x256x32xf32> to vector<256x32xf32>
      %40 = arith.truncf %39 : vector<256x32xf32> to vector<256x32xbf16>
      %c0_22 = arith.constant 0 : index
      %c0_23 = arith.constant 0 : index
      %41 = vector.load %arg3[%c0_22, %c0_23] : memref<32x24xbf16, #tpu.memory_space<vmem>>, vector<32x24xbf16>
      %cst_24 = arith.constant dense<0.000000e+00> : vector<256x24xf32>
      %42 = tpu.matmul %40, %41, %cst_24 {dimension_numbers = #tpu.dot_dimension_numbers<[1], [0], [0], [1], [0, 0, 1, 1], [], []>} : vector<256x32xbf16>, vector<32x24xbf16>, vector<256x24xf32> -> vector<256x24xf32>
      %c0_25 = arith.constant 0 : index
      %c0_26 = arith.constant 0 : index
      %43 = vector.load %arg4[%c0_25, %c0_26] : memref<1x24xf32, #tpu.memory_space<vmem>>, vector<1x24xf32>
      %44 = vector.broadcast %43 : vector<1x24xf32> to vector<256x24xf32>
      %45 = arith.addf %42, %44 : vector<256x24xf32>
      %46 = vector.extract_strided_slice %45 {offsets = [0, 0], sizes = [256, 4], strides = [1, 1]} : vector<256x24xf32> to vector<256x4xf32>
      %47 = arith.truncf %46 : vector<256x4xf32> to vector<256x4xbf16>
      %c0_27 = arith.constant 0 : index
      %c0_28 = arith.constant 0 : index
      %48 = vector.load %arg9[%c0_27, %c0_28] : memref<256x4xbf16, #tpu.memory_space<vmem>>, vector<256x4xbf16>
      tpu.vector_store %arg9[%c0_27, %c0_28], %47 {strides = array<i32>} : memref<256x4xbf16, #tpu.memory_space<vmem>>, vector<256x4xbf16>,
      %49 = vector.extract_strided_slice %45 {offsets = [0, 4], sizes = [256, 20], strides = [1, 1]} : vector<256x24xf32> to vector<256x20xf32>
      %50 = vector.extract_strided_slice %49 {offsets = [0, 0], sizes = [64, 20], strides = [1, 1]} : vector<256x20xf32> to vector<64x20xf32>
      %51 = vector.extract_strided_slice %49 {offsets = [64, 0], sizes = [64, 20], strides = [1, 1]} : vector<256x20xf32> to vector<64x20xf32>
      %52 = arith.maximumf %50, %51 : vector<64x20xf32>
      %53 = vector.extract_strided_slice %49 {offsets = [128, 0], sizes = [64, 20], strides = [1, 1]} : vector<256x20xf32> to vector<64x20xf32>
      %54 = arith.maximumf %52, %53 : vector<64x20xf32>
      %55 = vector.extract_strided_slice %49 {offsets = [192, 0], sizes = [64, 20], strides = [1, 1]} : vector<256x20xf32> to vector<64x20xf32>
      %56 = arith.maximumf %54, %55 : vector<64x20xf32>
      %57 = vector.extract_strided_slice %56 {offsets = [0, 0], sizes = [64, 4], strides = [1, 1]} : vector<64x20xf32> to vector<64x4xf32>
      %58 = arith.truncf %57 : vector<64x4xf32> to vector<64x4xbf16>
      %c0_29 = arith.constant 0 : index
      %c0_30 = arith.constant 0 : index
      %59 = vector.load %arg10[%c0_29, %c0_30] : memref<64x4xbf16, #tpu.memory_space<vmem>>, vector<64x4xbf16>
      tpu.vector_store %arg10[%c0_29, %c0_30], %58 {strides = array<i32>} : memref<64x4xbf16, #tpu.memory_space<vmem>>, vector<64x4xbf16>,
      %60 = vector.extract_strided_slice %56 {offsets = [0, 4], sizes = [64, 16], strides = [1, 1]} : vector<64x20xf32> to vector<64x16xf32>
      %61 = arith.truncf %60 : vector<64x16xf32> to vector<64x16xbf16>
      %c0_31 = arith.constant 0 : index
      %c0_32 = arith.constant 0 : index
      %62 = vector.load %arg11[%c0_31, %c0_32] : memref<64x16xbf16, #tpu.memory_space<vmem>>, vector<64x16xbf16>
      tpu.vector_store %arg11[%c0_31, %c0_32], %61 {strides = array<i32>} : memref<64x16xbf16, #tpu.memory_space<vmem>>, vector<64x16xbf16>,
    } else {
    }
    %c128_i32 = arith.constant 128 : i32
    %3 = arith.muli %arg1, %c128_i32 : i32
    %4 = tpu.assume_multiple %3, 128 : i32
    %5 = arith.index_cast %4 : i32 to index
    %c0 = arith.constant 0 : index
    %6 = vector.load %arg9[%5, %c0] : memref<256x4xbf16, #tpu.memory_space<vmem>>, vector<128x4xbf16>
    %c0_1 = arith.constant 0 : index
    %c0_2 = arith.constant 0 : index
    %7 = vector.load %arg10[%c0_1, %c0_2] : memref<64x4xbf16, #tpu.memory_space<vmem>>, vector<64x4xbf16>
    %cst = arith.constant dense<0.000000e+00> : vector<128x64xf32>
    %8 = tpu.matmul %6, %7, %cst {dimension_numbers = #tpu.dot_dimension_numbers<[1], [1], [0], [0], [0, 0, 1, 0], [], []>} : vector<128x4xbf16>, vector<64x4xbf16>, vector<128x64xf32> -> vector<128x64xf32>
    %cst_3 = arith.constant dense<0xFF800000> : vector<128xf32>
    %9 = vector.multi_reduction <maximumf>, %8, %cst_3 [1] : vector<128x64xf32> to vector<128xf32>
    %10 = vector.shape_cast %9 : vector<128xf32> to vector<128x1xf32>
    %11 = vector.broadcast %10 : vector<128x1xf32> to vector<128x64xf32>
    %12 = arith.subf %8, %11 : vector<128x64xf32>
    %13 = math.exp %12 : vector<128x64xf32>
    %cst_4 = arith.constant dense<0.000000e+00> : vector<128xf32>
    %14 = vector.multi_reduction <add>, %13, %cst_4 [1] : vector<128x64xf32> to vector<128xf32>
    %15 = vector.shape_cast %14 : vector<128xf32> to vector<128x1xf32>
    %16 = tpu.reciprocal %15 {approx = true} : vector<128x1xf32> -> vector<128x1xf32>
    %17 = vector.broadcast %16 : vector<128x1xf32> to vector<128x64xf32>
    %18 = arith.mulf %13, %17 : vector<128x64xf32>
    %19 = arith.truncf %18 : vector<128x64xf32> to vector<128x64xbf16>
    %c0_5 = arith.constant 0 : index
    %c0_6 = arith.constant 0 : index
    %20 = vector.load %arg11[%c0_5, %c0_6] : memref<64x16xbf16, #tpu.memory_space<vmem>>, vector<64x16xbf16>
    %cst_7 = arith.constant dense<0.000000e+00> : vector<128x16xf32>
    %21 = tpu.matmul %19, %20, %cst_7 {dimension_numbers = #tpu.dot_dimension_numbers<[1], [0], [0], [1], [0, 0, 1, 1], [], []>} : vector<128x64xbf16>, vector<64x16xbf16>, vector<128x16xf32> -> vector<128x16xf32>
    %22 = arith.truncf %21 : vector<128x16xf32> to vector<128x16xbf16>
    %c0_8 = arith.constant 0 : index
    %c0_9 = arith.constant 0 : index
    %23 = vector.load %arg5[%c0_8, %c0_9] : memref<16x32xbf16, #tpu.memory_space<vmem>>, vector<16x32xbf16>
    %cst_10 = arith.constant dense<0.000000e+00> : vector<128x32xf32>
    %24 = tpu.matmul %22, %23, %cst_10 {dimension_numbers = #tpu.dot_dimension_numbers<[1], [0], [0], [1], [0, 0, 1, 1], [], []>} : vector<128x16xbf16>, vector<16x32xbf16>, vector<128x32xf32> -> vector<128x32xf32>
    %c0_11 = arith.constant 0 : index
    %c0_12 = arith.constant 0 : index
    %25 = vector.load %arg6[%c0_11, %c0_12] : memref<1x32xf32, #tpu.memory_space<vmem>>, vector<1x32xf32>
    %26 = vector.broadcast %25 : vector<1x32xf32> to vector<128x32xf32>
    %27 = arith.addf %24, %26 : vector<128x32xf32>
    %c0_13 = arith.constant 0 : index
    %28 = arith.index_cast %4 : i32 to index
    %c0_14 = arith.constant 0 : index
    %29 = vector.load %arg2[%c0_13, %28, %c0_14] : memref<1x256x32xf32, #tpu.memory_space<vmem>>, vector<1x128x32xf32>
    %30 = vector.shape_cast %29 : vector<1x128x32xf32> to vector<128x32xf32>
    %c0_15 = arith.constant 0 : index
    %31 = memref.load %arg7[%c0_15] : memref<1xf32, #tpu.memory_space<smem>>
    %32 = vector.broadcast %31 : f32 to vector<128x32xf32>
    %33 = arith.mulf %32, %27 : vector<128x32xf32>
    %34 = arith.addf %33, %30 : vector<128x32xf32>
    %c0_16 = arith.constant 0 : index
    %c0_17 = arith.constant 0 : index
    %c0_18 = arith.constant 0 : index
    %35 = vector.load %arg8[%c0_16, %c0_17, %c0_18] : memref<1x128x32xf32, #tpu.memory_space<vmem>>, vector<1x128x32xf32>
    %36 = vector.shape_cast %35 : vector<1x128x32xf32> to vector<128x32xf32>
    %37 = vector.shape_cast %34 : vector<128x32xf32> to vector<1x128x32xf32>
    tpu.vector_store %arg8[%c0_16, %c0_17, %c0_18], %37 {strides = array<i32>} : memref<1x128x32xf32, #tpu.memory_space<vmem>>, vector<1x128x32xf32>,
    return
  }
  func.func @transform_0(%arg0: i32, %arg1: i32) -> (i32, i32, i32) {
    %c0_i32 = arith.constant 0 : i32
    %c0_i32_0 = arith.constant 0 : i32
    %c0_i32_1 = arith.constant 0 : i32
    return %arg0, %c0_i32, %c0_i32_0 : i32, i32, i32
  }
  func.func @transform_1(%arg0: i32, %arg1: i32) -> (i32, i32) {
    %c0_i32 = arith.constant 0 : i32
    %c0_i32_0 = arith.constant 0 : i32
    %c0_i32_1 = arith.constant 0 : i32
    return %c0_i32, %c0_i32_0 : i32, i32
  }
  func.func @transform_2(%arg0: i32, %arg1: i32) -> (i32, i32) {
    %c0_i32 = arith.constant 0 : i32
    %c0_i32_0 = arith.constant 0 : i32
    %c0_i32_1 = arith.constant 0 : i32
    return %c0_i32, %c0_i32_0 : i32, i32
  }
  func.func @transform_3(%arg0: i32, %arg1: i32) -> (i32, i32) {
    %c0_i32 = arith.constant 0 : i32
    %c0_i32_0 = arith.constant 0 : i32
    %c0_i32_1 = arith.constant 0 : i32
    return %c0_i32, %c0_i32_0 : i32, i32
  }
  func.func @transform_4(%arg0: i32, %arg1: i32) -> (i32, i32) {
    %c0_i32 = arith.constant 0 : i32
    %c0_i32_0 = arith.constant 0 : i32
    %c0_i32_1 = arith.constant 0 : i32
    return %c0_i32, %c0_i32_0 : i32, i32
  }
  func.func @transform_5(%arg0: i32, %arg1: i32) -> i32 {
    %c0_i32 = arith.constant 0 : i32
    %c0_i32_0 = arith.constant 0 : i32
    return %c0_i32 : i32
  }
  func.func @transform_6(%arg0: i32, %arg1: i32) -> (i32, i32, i32) {
    %c0_i32 = arith.constant 0 : i32
    %c0_i32_0 = arith.constant 0 : i32
    return %arg0, %arg1, %c0_i32 : i32, i32, i32
  }
}

</mosaic_0001>

<bundles_post_ra>
// kernel: tpu_custom_call.1
= control target key start
LH: loop header
LB: loop body
LE: loop exit
PB: predicated region body
PF: predicated region fallthrough
CT: control target
= control target key end

     0   :  { %s1725_s23 = smov 0   ;;  %s1727_s24 = smov 0   ;;  %s2197_s0 = inlined_call_operand.vmem [shape: f32[2,256,32], index: 0, kind: input, shape index: {}]   ;;  %s2198_s1 = inlined_call_operand.vmem [shape: bf16[32,24], index: 1, kind: input, shape index: {}]   ;;  %s2199_s2 = inlined_call_operand.vmem [shape: f32[1,24], index: 2, kind: input, shape index: {}]   ;;  %s2200_s3 = inlined_call_operand.vmem [shape: bf16[16,32], index: 3, kind: input, shape index: {}]   ;;  %s2201_s4 = inlined_call_operand.vmem [shape: f32[1,32], index: 4, kind: input, shape index: {}]   ;;  %s2202_s5 = inlined_call_operand.<no memory space> [shape: f32[1], index: 5, kind: input, shape index: {}]   ;;  %s2203_s6 = inlined_call_operand.vmem [shape: f32[2,256,32], index: 6, kind: output, shape index: {}]  }
   0x1   :  { %11 = sst [smem:[#allocation5]] %s2202_s5  ;;  %s1729_s25 = smov 0  }
   0x2   :  { %s1731_s26 = smov 0   ;;  %s1733_s27 = smov 0  }
   0x3 LB: > { %s26_s5 = sadd.s32 1, %s1675_s25  ;;  %s29_s28 = sadd.s32 1, %s1679_s26  ;;  %s1683_s27 = sphi %s1733_s27, %s17_s27   ;;  %s1679_s26 = sphi %s1731_s26, %s2207_s26   ;;  %s1675_s25 = sphi %s1729_s25, %s2206_s25   ;;  %s1671_s24 = sphi %s1727_s24, %s2205_s24   ;;  %s1667_s23 = sphi %s1725_s23, %s2204_s23  }
   0x4   : > { %p27_p0 = scmp.ge.s32.totalorder %s26_s5, 2  ;;  %p1376_p1 = scmp.ge.s32.totalorder %s1683_s27, 1 }
   0x5   : > { %p227_p2 = scmp.lt.s32.totalorder %s1683_s27, 5 }
   0x6   : > { %s2209_s5 = smov (%p27_p0, %s26_s5), 0  ;;  %s2211_s28 = smov (!%p27_p0, %s29_s28), %s1679_s26 }
   0x7   : > { %p228_p3 = pnand %p1376_p1, %p227_p2  ;;  %p31_p4 = scmp.ge.s32.totalorder %s2211_s28, 2 }
   0x8   : > { %p261_p5 = scmp.lt.s32.totalorder (!%p228_p3), %s1671_s24, 1  ;;  %s1379_s29 = sshll.u32 (!%p228_p3), %s1667_s23, 4 }
   0x9   : > { %s2213_s28 = smov (%p31_p4, %s2211_s28), 0  ;;  %231 = sbr.rel (%p228_p3) target bundleno = 1239 (0x4d7), region = 44 }
   0xa   : > { %p269_p6 = scmp.lt.s32.totalorder (!%p228_p3), %s1379_s29, 31  ;;  %p1382_p7 = scmp.ne.s32.totalorder (!%p228_p3), %s1667_s23, 0 }
   0xe   : > { %s2215_s24 = smov (!%p261_p5, %s1671_s24), 1  ;;  %s2217_s29 = smov (!%p269_p6, %s1379_s29), 31 }
   0xf   : > { %s1503_s30 = sshll.u32 %s2215_s24, 8  ;;  %s1380_s7 = sshll.u32 %s2215_s24, 5 }
  0x10   : > { %s1761_s10 = scalar_lea.vmem %s2197_s0, %s1503_s30  ;;  %s272_s11 = sadd.s32 %s1380_s7, %s2217_s29 }
  0x11   : > { %s1381_s12 = sshll.u32 %s272_s11, 3  ;;  %280 = sbr.rel (%p1382_p7) target bundleno = 351 (0x15f), region = 48 }
  0x12   : > { %s1766_s15 = scalar_lea.vmem %s2203_s6, %s1381_s12  ;;  %s1685_s22 = smov (!%p1382_p7), 120  }
  0x13   : > { %s1686_s24 = smov (!%p1382_p7), 124  }
  0x16   : > { %v1505_v0 = vld [vmem:[%s2198_s1 + $0x8] sm:$0xff]  ;;  %v1504_v1 = vld [vmem:[%s2198_s1] sm:$0xff]  ;;  %vm349_vm0 = vcmask 261120   ;;  %v283_v14 = vld [vmem:[%s1761_s10 + $0x10] sm:$0xff]  ;;  %vm519_vm1 = vcmask 27648   ;;  %vm648_vm2 = vcmask 125952  }
  0x17   : > { %v281_v2 = vld [vmem:[%s1761_s10] sm:$0xff]  ;;  %v282_v3 = vld [vmem:[%s1761_s10 + $0x8] sm:$0xff]  ;;  %404 = vmatpush.bf16.msra.mxu0 %v1505_v0  ;;  %1523 = vmatpush.bf16.msra.mxu1 %v1505_v0  ;;  %v284_v15 = vld [vmem:[%s1761_s10 + $0x18] sm:$0xff] }
  0x18   : > { %v289_v4 = vld [vmem:[%s1761_s10 + $0x40] sm:$0xff]  ;;  %v290_v5 = vld [vmem:[%s1761_s10 + $0x48] sm:$0xff]  ;;  %1524 = vmatpush.bf16.msra.mxu2 %v1505_v0  ;;  %1525 = vmatpush.bf16.msra.mxu3 %v1505_v0  ;;  %v313_v10 = vpack.c.bf16 %v282_v3, %v281_v2  ;;  %v291_v16 = vld [vmem:[%s1761_s10 + $0x50] sm:$0xff]  ;;  %v314_v22 = vpack.c.bf16 %v284_v15, %v283_v14 }
  0x19   : > { %v297_v6 = vld [vmem:[%s1761_s10 + $0x80] sm:$0xff]  ;;  %v298_v7 = vld [vmem:[%s1761_s10 + $0x88] sm:$0xff]  ;;  %v317_v11 = vpack.c.bf16 %v290_v5, %v289_v4  ;;  %v292_v17 = vld [vmem:[%s1761_s10 + $0x58] sm:$0xff] }
  0x1a   : > { %v305_v8 = vld [vmem:[%s1761_s10 + $0xc0] sm:$0xff]  ;;  %v306_v9 = vld [vmem:[%s1761_s10 + $0xc8] sm:$0xff]  ;;  %v321_v12 = vpack.c.bf16 %v298_v7, %v297_v6  ;;  %v299_v18 = vld [vmem:[%s1761_s10 + $0x90] sm:$0xff]  ;;  %v318_v23 = vpack.c.bf16 %v292_v17, %v291_v16 }
  0x1b   : > { %405 = vmatpush.bf16.msra.mxu0 %v1504_v1  ;;  %1526 = vmatpush.bf16.msra.mxu1 %v1504_v1  ;;  %v325_v13 = vpack.c.bf16 %v306_v9, %v305_v8  ;;  %v300_v19 = vld [vmem:[%s1761_s10 + $0x98] sm:$0xff]  ;;  %v307_v20 = vld [vmem:[%s1761_s10 + $0xd0] sm:$0xff]  ;;  %v285_v26 = vld [vmem:[%s1761_s10 + $0x20] sm:$0xff] }
  0x1c   : > { %1527 = vmatpush.bf16.msra.mxu2 %v1504_v1  ;;  %1528 = vmatpush.bf16.msra.mxu3 %v1504_v1  ;;  %v308_v21 = vld [vmem:[%s1761_s10 + $0xd8] sm:$0xff]  ;;  %v322_v24 = vpack.c.bf16 %v300_v19, %v299_v18  ;;  %v286_v27 = vld [vmem:[%s1761_s10 + $0x28] sm:$0xff]  ;;  %v293_v28 = vld [vmem:[%s1761_s10 + $0x60] sm:$0xff] }
  0x1d   : > { %v326_v25 = vpack.c.bf16 %v308_v21, %v307_v20  ;;  %v294_v29 = vld [vmem:[%s1761_s10 + $0x68] sm:$0xff]  ;;  %v301_v30 = vld [vmem:[%s1761_s10 + $0xa0] sm:$0xff]  ;;  %v315_v34 = vpack.c.bf16 %v286_v27, %v285_v26  ;;  %v287_v38 = vld [vmem:[%s1761_s10 + $0x30] sm:$0xff] }
  0x1e   : > { %1391 = vmatmul.msk.bf16.vlgmr.msra.gmra.mxu0 %vm349_vm0, %v313_v10  ;;  %1395 = vmatmul.msk.bf16.vlgmr.msra.gmra.mxu1 %vm349_vm0, %v317_v11  ;;  %v302_v31 = vld [vmem:[%s1761_s10 + $0xa8] sm:$0xff]  ;;  %v309_v32 = vld [vmem:[%s1761_s10 + $0xe0] sm:$0xff]  ;;  %v319_v35 = vpack.c.bf16 %v294_v29, %v293_v28  ;;  %v288_v39 = vld [vmem:[%s1761_s10 + $0x38] sm:$0xff] }
  0x1f   : > { %1399 = vmatmul.msk.bf16.vlgmr.msra.gmra.mxu2 %vm349_vm0, %v321_v12  ;;  %1403 = vmatmul.msk.bf16.vlgmr.msra.gmra.mxu3 %vm349_vm0, %v325_v13  ;;  %v310_v33 = vld [vmem:[%s1761_s10 + $0xe8] sm:$0xff]  ;;  %v323_v36 = vpack.c.bf16 %v302_v31, %v301_v30  ;;  %v295_v40 = vld [vmem:[%s1761_s10 + $0x70] sm:$0xff]  ;;  %v296_v41 = vld [vmem:[%s1761_s10 + $0x78] sm:$0xff]  ;;  %v316_v46 = vpack.c.bf16 %v288_v39, %v287_v38 }
  0x20   : > { %v327_v37 = vpack.c.bf16 %v310_v33, %v309_v32  ;;  %v303_v42 = vld [vmem:[%s1761_s10 + $0xb0] sm:$0xff]  ;;  %v304_v43 = vld [vmem:[%s1761_s10 + $0xb8] sm:$0xff]  ;;  %v320_v47 = vpack.c.bf16 %v296_v41, %v295_v40  ;;  %v1826_v50 = vld [vmem:[%s2199_s2] ss:$0 sm:$0xff] }
  0x21   : > { %v311_v44 = vld [vmem:[%s1761_s10 + $0xf0] sm:$0xff]  ;;  %v312_v45 = vld [vmem:[%s1761_s10 + $0xf8] sm:$0xff]  ;;  %v324_v48 = vpack.c.bf16 %v304_v43, %v303_v42 }
  0x22   : > { %v328_v49 = vpack.c.bf16 %v312_v45, %v311_v44 }
  0x2e   : > { %1392 = vmatmul.msk.bf16.gmra.mxu0 %vm349_vm0, %v314_v22  ;;  %1396 = vmatmul.msk.bf16.gmra.mxu1 %vm349_vm0, %v318_v23 }
  0x2f   : > { %1400 = vmatmul.msk.bf16.gmra.mxu2 %vm349_vm0, %v322_v24  ;;  %1404 = vmatmul.msk.bf16.gmra.mxu3 %vm349_vm0, %v326_v25 }
  0x3e   : > { %1393 = vmatmul.msk.bf16.gmra.mxu0 %vm349_vm0, %v315_v34  ;;  %1397 = vmatmul.msk.bf16.gmra.mxu1 %vm349_vm0, %v319_v35 }
  0x3f   : > { %1401 = vmatmul.msk.bf16.gmra.mxu2 %vm349_vm0, %v323_v36  ;;  %1405 = vmatmul.msk.bf16.gmra.mxu3 %vm349_vm0, %v327_v37 }
  0x4e   : > { %1394 = vmatmul.msk.bf16.gmra.mxu0 %vm349_vm0, %v316_v46  ;;  %1398 = vmatmul.msk.bf16.gmra.mxu1 %vm349_vm0, %v320_v47 }
  0x4f   : > { %1402 = vmatmul.msk.bf16.gmra.mxu2 %vm349_vm0, %v324_v48  ;;  %1406 = vmatmul.msk.bf16.gmra.mxu3 %vm349_vm0, %v328_v49 }
  0x9b   : > { %v407_v51 = vpop.f32.mrf.mxu0  ;;  %v427_v52 = vpop.f32.mrf.mxu1 }
  0x9c   : > { %v408_v53 = vadd.f32 %v1826_v50, %v407_v51  ;;  %v428_v54 = vadd.f32 %v1826_v50, %v427_v52 }
  0x9e   : > { %v487_v55 = vpack.c.bf16 %v408_v53, %v408_v53  ;;  %v495_v56 = vpack.c.bf16 %v428_v54, %v428_v54  ;;  %v552_v57 = vmax.f32 %v408_v53, %v428_v54 }
  0xa0   : > { %520 = vst.msk [vmem:[#allocation2] sm:$0xf] %vm519_vm1, %v487_v55 }
  0xa1   : > { %528 = vst.msk [vmem:[#allocation2 + $0x20] sm:$0xf] %vm519_vm1, %v495_v56 }
  0xa2   : > { %v447_v58 = vpop.f32.mrf.mxu2  ;;  %v467_v59 = vpop.f32.mrf.mxu3 }
  0xa3   : > { %v448_v60 = vadd.f32 %v1826_v50, %v447_v58  ;;  %v468_v61 = vadd.f32 %v1826_v50, %v467_v59  ;;  %v409_v62 = vpop.f32.mrf.mxu0  ;;  %v429_v63 = vpop.f32.mrf.mxu1 }
  0xa4   : > { %v410_v0 = vadd.f32 %v1826_v50, %v409_v62  ;;  %v430_v1 = vadd.f32 %v1826_v50, %v429_v63 }
  0xa5   : > { %v503_v2 = vpack.c.bf16 %v448_v60, %v448_v60  ;;  %v560_v3 = vmax.f32 %v552_v57, %v448_v60  ;;  %v511_v4 = vpack.c.bf16 %v468_v61, %v468_v61 }
  0xa6   : > { %v488_v5 = vpack.c.bf16 %v410_v0, %v410_v0  ;;  %v496_v6 = vpack.c.bf16 %v430_v1, %v430_v1  ;;  %v553_v11 = vmax.f32 %v410_v0, %v430_v1 }
  0xa7   : > { %536 = vst.msk [vmem:[#allocation2 + $0x40] sm:$0xf] %vm519_vm1, %v503_v2  ;;  %v568_v7 = vmax.f32 %v560_v3, %v468_v61 }
  0xa8   : > { %544 = vst.msk [vmem:[#allocation2 + $0x60] sm:$0xf] %vm519_vm1, %v511_v4 }
  0xa9   : > { %521 = vst.msk [vmem:[#allocation2 + $0x4] sm:$0xf] %vm519_vm1, %v488_v5  ;;  %v576_v8 = vpack.c.bf16 %v568_v7, %v568_v7 }
  0xaa   : > { %529 = vst.msk [vmem:[#allocation2 + $0x24] sm:$0xf] %vm519_vm1, %v496_v6  ;;  %v449_v9 = vpop.f32.mrf.mxu2  ;;  %v469_v10 = vpop.f32.mrf.mxu3 }
  0xab   : > { %v450_v12 = vadd.f32 %v1826_v50, %v449_v9  ;;  %v470_v13 = vadd.f32 %v1826_v50, %v469_v10  ;;  %624 = vrot.lane.b32.xlu2 %v576_v8, %s1685_s22  ;;  %592 = vrot.lane.b32.xlu0 %v576_v8, %s1686_s24  ;;  %v412_v14 = vpop.f32.mrf.mxu0  ;;  %v432_v15 = vpop.f32.mrf.mxu1 }
  0xac   : > { %v413_v16 = vadd.f32 %v1826_v50, %v412_v14  ;;  %v433_v17 = vadd.f32 %v1826_v50, %v432_v15 }
  0xad   : > { %v504_v18 = vpack.c.bf16 %v450_v12, %v450_v12  ;;  %v561_v19 = vmax.f32 %v553_v11, %v450_v12  ;;  %v512_v20 = vpack.c.bf16 %v470_v13, %v470_v13 }
  0xae   : > { %v489_v21 = vpack.c.bf16 %v413_v16, %v413_v16  ;;  %v497_v22 = vpack.c.bf16 %v433_v17, %v433_v17  ;;  %v554_v25 = vmax.f32 %v413_v16, %v433_v17 }
  0xaf   : > { %537 = vst.msk [vmem:[#allocation2 + $0x44] sm:$0xf] %vm519_vm1, %v504_v18  ;;  %v569_v23 = vmax.f32 %v561_v19, %v470_v13 }
  0xb0   : > { %545 = vst.msk [vmem:[#allocation2 + $0x64] sm:$0xf] %vm519_vm1, %v512_v20 }
  0xb1   : > { %v577_v24 = vpack.c.bf16 %v569_v23, %v569_v23  ;;  %522 = vst.msk [vmem:[#allocation2 + $0x8] sm:$0xf] %vm519_vm1, %v489_v21 }
  0xb2   : > { %530 = vst.msk [vmem:[#allocation2 + $0x28] sm:$0xf] %vm519_vm1, %v497_v22  ;;  %v452_v26 = vpop.f32.mrf.mxu2  ;;  %v472_v27 = vpop.f32.mrf.mxu3 }
  0xb3   : > { %v453_v28 = vadd.f32 %v1826_v50, %v452_v26  ;;  %v473_v29 = vadd.f32 %v1826_v50, %v472_v27  ;;  %594 = vrot.lane.b32.xlu0 %v577_v24, %s1686_s24  ;;  %v414_v30 = vpop.f32.mrf.mxu0  ;;  %v434_v31 = vpop.f32.mrf.mxu1 }
  0xb4   : > { %v415_v32 = vadd.f32 %v1826_v50, %v414_v30  ;;  %v435_v33 = vadd.f32 %v1826_v50, %v434_v31 }
  0xb5   : > { %v505_v34 = vpack.c.bf16 %v453_v28, %v453_v28  ;;  %v562_v35 = vmax.f32 %v554_v25, %v453_v28  ;;  %v513_v36 = vpack.c.bf16 %v473_v29, %v473_v29 }
  0xb6   : > { %v490_v37 = vpack.c.bf16 %v415_v32, %v415_v32  ;;  %v498_v38 = vpack.c.bf16 %v435_v33, %v435_v33  ;;  %v555_v43 = vmax.f32 %v415_v32, %v435_v33 }
  0xb7   : > { %538 = vst.msk [vmem:[#allocation2 + $0x48] sm:$0xf] %vm519_vm1, %v505_v34  ;;  %v570_v39 = vmax.f32 %v562_v35, %v473_v29 }
  0xb8   : > { %546 = vst.msk [vmem:[#allocation2 + $0x68] sm:$0xf] %vm519_vm1, %v513_v36 }
  0xb9   : > { %523 = vst.msk [vmem:[#allocation2 + $0xc] sm:$0xf] %vm519_vm1, %v490_v37  ;;  %v578_v40 = vpack.c.bf16 %v570_v39, %v570_v39 }
  0xba   : > { %531 = vst.msk [vmem:[#allocation2 + $0x2c] sm:$0xf] %vm519_vm1, %v498_v38  ;;  %v454_v41 = vpop.f32.mrf.mxu2  ;;  %v474_v42 = vpop.f32.mrf.mxu3 }
  0xbb   : > { %v455_v44 = vadd.f32 %v1826_v50, %v454_v41  ;;  %v475_v45 = vadd.f32 %v1826_v50, %v474_v42  ;;  %596 = vrot.lane.b32.xlu1 %v578_v40, %s1686_s24  ;;  %626 = vrot.lane.b32.xlu0 %v577_v24, %s1685_s22  ;;  %v417_v46 = vpop.f32.mrf.mxu0  ;;  %v437_v47 = vpop.f32.mrf.mxu1 }
  0xbc   : > { %v418_v48 = vadd.f32 %v1826_v50, %v417_v46  ;;  %v438_v49 = vadd.f32 %v1826_v50, %v437_v47 }
  0xbd   : > { %v506_v51 = vpack.c.bf16 %v455_v44, %v455_v44  ;;  %v563_v52 = vmax.f32 %v555_v43, %v455_v44  ;;  %v514_v53 = vpack.c.bf16 %v475_v45, %v475_v45 }
  0xbe   : > { %v491_v54 = vpack.c.bf16 %v418_v48, %v418_v48  ;;  %v499_v55 = vpack.c.bf16 %v438_v49, %v438_v49  ;;  %v556_v58 = vmax.f32 %v418_v48, %v438_v49 }
  0xbf   : > { %539 = vst.msk [vmem:[#allocation2 + $0x4c] sm:$0xf] %vm519_vm1, %v506_v51  ;;  %v571_v56 = vmax.f32 %v563_v52, %v475_v45 }
  0xc0   : > { %547 = vst.msk [vmem:[#allocation2 + $0x6c] sm:$0xf] %vm519_vm1, %v514_v53 }
  0xc1   : > { %v579_v57 = vpack.c.bf16 %v571_v56, %v571_v56  ;;  %524 = vst.msk [vmem:[#allocation2 + $0x10] sm:$0xf] %vm519_vm1, %v491_v54 }
  0xc2   : > { %532 = vst.msk [vmem:[#allocation2 + $0x30] sm:$0xf] %vm519_vm1, %v499_v55  ;;  %v457_v59 = vpop.f32.mrf.mxu2  ;;  %v477_v60 = vpop.f32.mrf.mxu3 }
  0xc3   : > { %v458_v61 = vadd.f32 %v1826_v50, %v457_v59  ;;  %v478_v62 = vadd.f32 %v1826_v50, %v477_v60  ;;  %628 = vrot.lane.b32.xlu1 %v578_v40, %s1685_s22  ;;  %630 = vrot.lane.b32.xlu2 %v579_v57, %s1685_s22  ;;  %v419_v63 = vpop.f32.mrf.mxu0  ;;  %v439_v0 = vpop.f32.mrf.mxu1 }
  0xc4   : > { %v420_v1 = vadd.f32 %v1826_v50, %v419_v63  ;;  %v440_v2 = vadd.f32 %v1826_v50, %v439_v0 }
  0xc5   : > { %v507_v3 = vpack.c.bf16 %v458_v61, %v458_v61  ;;  %v564_v4 = vmax.f32 %v556_v58, %v458_v61  ;;  %v515_v5 = vpack.c.bf16 %v478_v62, %v478_v62 }
  0xc6   : > { %v492_v6 = vpack.c.bf16 %v420_v1, %v420_v1  ;;  %v500_v7 = vpack.c.bf16 %v440_v2, %v440_v2  ;;  %v557_v12 = vmax.f32 %v420_v1, %v440_v2 }
  0xc7   : > { %540 = vst.msk [vmem:[#allocation2 + $0x50] sm:$0xf] %vm519_vm1, %v507_v3  ;;  %v572_v8 = vmax.f32 %v564_v4, %v478_v62 }
  0xc8   : > { %548 = vst.msk [vmem:[#allocation2 + $0x70] sm:$0xf] %vm519_vm1, %v515_v5 }
  0xc9   : > { %v580_v9 = vpack.c.bf16 %v572_v8, %v572_v8  ;;  %525 = vst.msk [vmem:[#allocation2 + $0x14] sm:$0xf] %vm519_vm1, %v492_v6 }
  0xca   : > { %533 = vst.msk [vmem:[#allocation2 + $0x34] sm:$0xf] %vm519_vm1, %v500_v7  ;;  %v459_v10 = vpop.f32.mrf.mxu2  ;;  %v479_v11 = vpop.f32.mrf.mxu3 }
  0xcb   : > { %v460_v13 = vadd.f32 %v1826_v50, %v459_v10  ;;  %v480_v14 = vadd.f32 %v1826_v50, %v479_v11  ;;  %598 = vrot.lane.b32.xlu1 %v579_v57, %s1686_s24  ;;  %600 = vrot.lane.b32.xlu2 %v580_v9, %s1686_s24  ;;  %v422_v15 = vpop.f32.mrf.mxu0  ;;  %v442_v16 = vpop.f32.mrf.mxu1 }
  0xcc   : > { %632 = vrot.lane.b32.xlu0 %v580_v9, %s1685_s22  ;;  %v423_v17 = vadd.f32 %v1826_v50, %v422_v15  ;;  %v443_v18 = vadd.f32 %v1826_v50, %v442_v16 }
  0xcd   : > { %v508_v19 = vpack.c.bf16 %v460_v13, %v460_v13  ;;  %v565_v20 = vmax.f32 %v557_v12, %v460_v13  ;;  %v516_v21 = vpack.c.bf16 %v480_v14, %v480_v14 }
  0xce   : > { %v493_v22 = vpack.c.bf16 %v423_v17, %v423_v17  ;;  %v501_v23 = vpack.c.bf16 %v443_v18, %v443_v18  ;;  %v558_v26 = vmax.f32 %v423_v17, %v443_v18 }
  0xcf   : > { %541 = vst.msk [vmem:[#allocation2 + $0x54] sm:$0xf] %vm519_vm1, %v508_v19  ;;  %v573_v24 = vmax.f32 %v565_v20, %v480_v14 }
  0xd0   : > { %549 = vst.msk [vmem:[#allocation2 + $0x74] sm:$0xf] %vm519_vm1, %v516_v21 }
  0xd1   : > { %v581_v25 = vpack.c.bf16 %v573_v24, %v573_v24  ;;  %526 = vst.msk [vmem:[#allocation2 + $0x18] sm:$0xf] %vm519_vm1, %v493_v22 }
  0xd2   : > { %534 = vst.msk [vmem:[#allocation2 + $0x38] sm:$0xf] %vm519_vm1, %v501_v23  ;;  %v462_v27 = vpop.f32.mrf.mxu2  ;;  %v482_v28 = vpop.f32.mrf.mxu3 }
  0xd3   : > { %v463_v29 = vadd.f32 %v1826_v50, %v462_v27  ;;  %v483_v30 = vadd.f32 %v1826_v50, %v482_v28  ;;  %602 = vrot.lane.b32.xlu2 %v581_v25, %s1686_s24  ;;  %v424_v31 = vpop.f32.mrf.mxu0  ;;  %v444_v32 = vpop.f32.mrf.mxu1 }
  0xd4   : > { %v425_v33 = vadd.f32 %v1826_v50, %v424_v31  ;;  %v445_v34 = vadd.f32 %v1826_v50, %v444_v32 }
  0xd5   : > { %v509_v35 = vpack.c.bf16 %v463_v29, %v463_v29  ;;  %v566_v36 = vmax.f32 %v558_v26, %v463_v29  ;;  %v517_v37 = vpack.c.bf16 %v483_v30, %v483_v30 }
  0xd6   : > { %v494_v38 = vpack.c.bf16 %v425_v33, %v425_v33  ;;  %v502_v39 = vpack.c.bf16 %v445_v34, %v445_v34  ;;  %v559_v44 = vmax.f32 %v425_v33, %v445_v34 }
  0xd7   : > { %542 = vst.msk [vmem:[#allocation2 + $0x58] sm:$0xf] %vm519_vm1, %v509_v35  ;;  %v574_v40 = vmax.f32 %v566_v36, %v483_v30 }
  0xd8   : > { %550 = vst.msk [vmem:[#allocation2 + $0x78] sm:$0xf] %vm519_vm1, %v517_v37 }
  0xd9   : > { %v582_v41 = vpack.c.bf16 %v574_v40, %v574_v40  ;;  %527 = vst.msk [vmem:[#allocation2 + $0x1c] sm:$0xf] %vm519_vm1, %v494_v38 }
  0xda   : > { %535 = vst.msk [vmem:[#allocation2 + $0x3c] sm:$0xf] %vm519_vm1, %v502_v39  ;;  %v464_v42 = vpop.f32.mrf.mxu2  ;;  %v484_v43 = vpop.f32.mrf.mxu3 }
  0xdb   : > { %v465_v45 = vadd.f32 %v1826_v50, %v464_v42  ;;  %v485_v46 = vadd.f32 %v1826_v50, %v484_v43  ;;  %636 = vrot.lane.b32.xlu2 %v582_v41, %s1685_s22  ;;  %604 = vrot.lane.b32.xlu0 %v582_v41, %s1686_s24 }
  0xdd   : > { %v510_v47 = vpack.c.bf16 %v465_v45, %v465_v45  ;;  %v567_v48 = vmax.f32 %v559_v44, %v465_v45  ;;  %v518_v49 = vpack.c.bf16 %v485_v46, %v485_v46 }
  0xdf   : > { %543 = vst.msk [vmem:[#allocation2 + $0x5c] sm:$0xf] %vm519_vm1, %v510_v47  ;;  %v575_v51 = vmax.f32 %v567_v48, %v485_v46 }
  0xe0   : > { %551 = vst.msk [vmem:[#allocation2 + $0x7c] sm:$0xf] %vm519_vm1, %v518_v49 }
  0xe1   : > { %v583_v52 = vpack.c.bf16 %v575_v51, %v575_v51 }
  0xe3   : > { %606 = vrot.lane.b32.xlu1 %v583_v52, %s1686_s24  ;;  %638 = vrot.lane.b32.xlu0 %v583_v52, %s1685_s22 }
  0xeb   : > { %634 = vrot.lane.b32.xlu1 %v581_v25, %s1685_s22 }
 0x105   : > { %v625_v50 = vpop.permute.xlu2 %624 }
 0x106   : > { %649 = vst.msk [vmem:[#allocation4] sm:$0xf] %vm648_vm2, %v625_v50 }
 0x11d   : > { %v631_v53 = vpop.permute.xlu2 %630  ;;  %v593_v54 = vpop.permute.xlu0 %592 }
 0x11e   : > { %652 = vst.msk [vmem:[#allocation4 + $0xc] sm:$0xf] %vm648_vm2, %v631_v53 }
 0x11f   : > { %616 = vst.msk [vmem:[#allocation3] sm:$0xf] %vm519_vm1, %v593_v54 }
 0x125   : > { %v601_v55 = vpop.permute.xlu2 %600  ;;  %v595_v56 = vpop.permute.xlu0 %594 }
 0x126   : > { %620 = vst.msk [vmem:[#allocation3 + $0x10] sm:$0xf] %vm519_vm1, %v601_v55 }
 0x127   : > { %617 = vst.msk [vmem:[#allocation3 + $0x4] sm:$0xf] %vm519_vm1, %v595_v56 }
 0x12d   : > { %v597_v57 = vpop.permute.xlu1 %596  ;;  %v603_v58 = vpop.permute.xlu2 %602 }
 0x12e   : > { %618 = vst.msk [vmem:[#allocation3 + $0x8] sm:$0xf] %vm519_vm1, %v597_v57  ;;  %v627_v59 = vpop.permute.xlu0 %626 }
 0x12f   : > { %621 = vst.msk [vmem:[#allocation3 + $0x14] sm:$0xf] %vm519_vm1, %v603_v58 }
 0x130   : > { %650 = vst.msk [vmem:[#allocation4 + $0x4] sm:$0xf] %vm648_vm2, %v627_v59 }
 0x135   : > { %v629_v60 = vpop.permute.xlu1 %628  ;;  %v637_v61 = vpop.permute.xlu2 %636 }
 0x136   : > { %651 = vst.msk [vmem:[#allocation4 + $0x8] sm:$0xf] %vm648_vm2, %v629_v60 }
 0x137   : > { %655 = vst.msk [vmem:[#allocation4 + $0x18] sm:$0xf] %vm648_vm2, %v637_v61 }
 0x13d   : > { %v599_v62 = vpop.permute.xlu1 %598 }
 0x13e   : > { %619 = vst.msk [vmem:[#allocation3 + $0xc] sm:$0xf] %vm519_vm1, %v599_v62  ;;  %v633_v63 = vpop.permute.xlu0 %632 }
 0x13f   : > { %653 = vst.msk [vmem:[#allocation4 + $0x10] sm:$0xf] %vm648_vm2, %v633_v63 }
 0x14d   : > { %v605_v0 = vpop.permute.xlu0 %604 }
 0x14e   : > { %622 = vst.msk [vmem:[#allocation3 + $0x18] sm:$0xf] %vm519_vm1, %v605_v0 }
 0x155   : > { %v607_v1 = vpop.permute.xlu1 %606  ;;  %v639_v2 = vpop.permute.xlu0 %638 }
 0x156   : > { %623 = vst.msk [vmem:[#allocation3 + $0x1c] sm:$0xf] %vm519_vm1, %v607_v1 }
 0x157   : > { %656 = vst.msk [vmem:[#allocation4 + $0x1c] sm:$0xf] %vm648_vm2, %v639_v2 }
 0x15d   : > { %v635_v3 = vpop.permute.xlu1 %634 }
 0x15e   : > { %654 = vst.msk [vmem:[#allocation4 + $0x14] sm:$0xf] %vm648_vm2, %v635_v3 }
 0x15f PF: > { %v1517_v4 = vld [vmem:[#allocation3 + $0x18] sm:$0xff]  ;;  %vm746_vm3 = vcmask 31744   ;;  %v1516_v6 = vld [vmem:[#allocation3 + $0x10] sm:$0xff]  ;;  %v1515_v8 = vld [vmem:[#allocation3 + $0x8] sm:$0xff]  ;;  %s1407_s29 = sshll.u32 %s1667_s23, 7  ;;  %vm832_vm4 = vcmask 523264  }
 0x160   : > { %v781_v5 = vsel %vm746_vm3, %v1517_v4, 0  ;;  %v778_v7 = vsel %vm746_vm3, %v1516_v6, 0  ;;  %v775_v9 = vsel %vm746_vm3, %v1515_v8, 0  ;;  %v1514_v10 = vld [vmem:[#allocation3] sm:$0xff]  ;;  %s658_s30 = sshra.s32 %s1407_s29, 3  ;;  %vm1142_vm5 = vcmask 130048   ;;  %s2095_s16 = scalar_lea.vmem %s1761_s10, %s1407_s29 }
 0x161   : > { %787 = vmatpush.bf16.xpose.msra.mxu0 %v781_v5  ;;  %1529 = vmatpush.bf16.xpose.msra.mxu3 %v781_v5  ;;  %v772_v11 = vsel %vm746_vm3, %v1514_v10, 0  ;;  %s1408_s7 = sshll.u32 %s658_s30, 2  ;;  %s1233_s12 = sld [smem:[#allocation5]]  ;;  %vm1267_vm6 = vcmask 261120  }
 0x162   : > { %s661_s8 = scalar_lea.vmem [#allocation2], %s1408_s7 }
 0x163   : > { %v1506_v12 = vld [vmem:[%s661_s8] sm:$0xff]  ;;  %v1507_v13 = vld [vmem:[%s661_s8 + $0x8] sm:$0xff]  ;;  %v1508_v14 = vld [vmem:[%s661_s8 + $0x10] sm:$0xff] }
 0x164   : > { %v1509_v15 = vld [vmem:[%s661_s8 + $0x18] sm:$0xff]  ;;  %v1510_v16 = vld [vmem:[%s661_s8 + $0x20] sm:$0xff]  ;;  %v1511_v17 = vld [vmem:[%s661_s8 + $0x28] sm:$0xff] }
 0x165   : > { %v1512_v18 = vld [vmem:[%s661_s8 + $0x30] sm:$0xff]  ;;  %v1513_v21 = vld [vmem:[%s661_s8 + $0x38] sm:$0xff] }
 0x169   : > { %788 = vmatpush.bf16.xpose.msra.mxu0 %v778_v7  ;;  %1530 = vmatpush.bf16.xpose.msra.mxu3 %v778_v7 }
 0x171   : > { %789 = vmatpush.bf16.xpose.msra.mxu0 %v775_v9  ;;  %1531 = vmatpush.bf16.xpose.msra.mxu3 %v775_v9 }
 0x179   : > { %790 = vmatpush.bf16.xpose.msra.mxu0 %v772_v11  ;;  %1532 = vmatpush.bf16.xpose.msra.mxu3 %v772_v11 }
 0x180   : > { %1457 = vmatmul.msk.bf16.vlgmr.msra.gmra.mxu0 %vm746_vm3, %v1506_v12  ;;  %1463 = vmatmul.msk.bf16.vlgmr.msra.gmra.mxu3 %vm746_vm3, %v1512_v18 }
 0x190   : > { %1458 = vmatmul.msk.bf16.gmra.mxu0 %vm746_vm3, %v1507_v13  ;;  %1464 = vmatmul.msk.bf16.gmra.mxu3 %vm746_vm3, %v1513_v21 }
 0x1a0   : > { %1459 = vmatmul.msk.bf16.gmra.mxu0 %vm746_vm3, %v1508_v14 }
 0x1b0   : > { %1460 = vmatmul.msk.bf16.gmra.mxu0 %vm746_vm3, %v1509_v15 }
 0x1c0   : > { %1461 = vmatmul.msk.bf16.gmra.mxu0 %vm746_vm3, %v1510_v16 }
 0x1d0   : > { %1462 = vmatmul.msk.bf16.gmra.mxu0 %vm746_vm3, %v1511_v17 }
 0x1fd   : > { %v792_v19 = vpop.f32.mrf.mxu0 }
 0x1fe   : > { %v833_v20 = vsel %vm832_vm4, %v792_v19, -inf }
 0x1ff   : > { %834 = vmax.xlane.f32.xlu0 %v833_v20 }
 0x203   : > { %v1981_v1 = vpop.f32.mrf.mxu3 }
 0x204   : > { %v869_v6 = vsel %vm832_vm4, %v1981_v1, -inf }
 0x205   : > { %v794_v22 = vpop.f32.mrf.mxu0 }
 0x206   : > { %v836_v23 = vsel %vm832_vm4, %v794_v22, -inf }
 0x207   : > { %837 = vmax.xlane.f32.xlu0 %v836_v23 }
 0x20b   : > { %v1993_v10 = vpop.f32.mrf.mxu3 }
 0x20c   : > { %v872_v15 = vsel %vm832_vm4, %v1993_v10, -inf }
 0x20d   : > { %v797_v24 = vpop.f32.mrf.mxu0 }
 0x20e   : > { %v839_v25 = vsel %vm832_vm4, %v797_v24, -inf }
 0x20f   : > { %840 = vmax.xlane.f32.xlu1 %v839_v25 }
 0x213   : > { %v2002_v17 = vpop.f32.mrf.mxu3 }
 0x214   : > { %v875_v20 = vsel %vm832_vm4, %v2002_v17, -inf }
 0x215   : > { %v799_v26 = vpop.f32.mrf.mxu0 }
 0x216   : > { %v842_v27 = vsel %vm832_vm4, %v799_v26, -inf }
 0x217   : > { %843 = vmax.xlane.f32.xlu1 %v842_v27 }
 0x21b   : > { %v2011_v25 = vpop.f32.mrf.mxu3 }
 0x21d   : > { %v802_v28 = vpop.f32.mrf.mxu0 }
 0x21e   : > { %v845_v29 = vsel %vm832_vm4, %v802_v28, -inf }
 0x21f   : > { %846 = vmax.xlane.f32.xlu2 %v845_v29  ;;  %v878_v29 = vsel %vm832_vm4, %v2011_v25, -inf }
 0x225   : > { %v804_v30 = vpop.f32.mrf.mxu0 }
 0x226   : > { %v848_v31 = vsel %vm832_vm4, %v804_v30, -inf }
 0x227   : > { %849 = vmax.xlane.f32.xlu2 %v848_v31 }
 0x22d   : > { %v1945_v32 = vpop.f32.mrf.mxu0 }
 0x22e   : > { %v851_v33 = vsel %vm832_vm4, %v1945_v32, -inf }
 0x22f   : > { %852 = vmax.xlane.f32.xlu0 %v851_v33  ;;  %v1521_v33 = vld [vmem:[#allocation4 + $0x18] sm:$0xff] }
 0x230   : > { %1077 = vmatpush.bf16.msra.mxu1 %v1521_v33  ;;  %1533 = vmatpush.bf16.msrb.mxu3 %v1521_v33 }
 0x235   : > { %v1949_v34 = vpop.f32.mrf.mxu0 }
 0x236   : > { %v854_v35 = vsel %vm832_vm4, %v1949_v34, -inf }
 0x237   : > { %855 = vmax.xlane.f32.xlu1 %v854_v35  ;;  %v1519_v35 = vld [vmem:[#allocation4 + $0x8] sm:$0xff] }
 0x23d   : > { %v1953_v36 = vpop.f32.mrf.mxu0 }
 0x23e   : > { %v857_v37 = vsel %vm832_vm4, %v1953_v36, -inf }
 0x23f   : > { %858 = vmax.xlane.f32.xlu1 %v857_v37 }
 0x245   : > { %v1961_v46 = vpop.f32.mrf.mxu0 }
 0x246   : > { %v860_v50 = vsel %vm832_vm4, %v1961_v46, -inf }
 0x24d   : > { %v1969_v53 = vpop.f32.mrf.mxu0 }
 0x24e   : > { %v863_v56 = vsel %vm832_vm4, %v1969_v53, -inf }
 0x255   : > { %v1977_v62 = vpop.f32.mrf.mxu0 }
 0x256   : > { %v866_v3 = vsel %vm832_vm4, %v1977_v62, -inf }
 0x272   : > { %v835_v38 = vpop.xlane.xlu0 %834 }
 0x273   : > { %v881_v39 = vsub.f32 %v792_v19, %v835_v38 }
 0x275   : > { %v897_v40 = vmul.f32 1.442695, %v881_v39 }
 0x277   : > { %1581 = vpow2.f32 %v897_v40 }
 0x27a   : > { %v838_v41 = vpop.xlane.xlu0 %837 }
 0x27b   : > { %v882_v42 = vsub.f32 %v794_v22, %v838_v41 }
 0x27d   : > { %v1957_v43 = vpop.eup %1581  ;;  %v899_v44 = vmul.f32 1.442695, %v882_v42 }
 0x27e   : > { %v929_v45 = vsel %vm832_vm4, %v1957_v43, 0.0 }
 0x27f   : > { %1583 = vpow2.f32 %v899_v44  ;;  %930 = vadd.xlane.f32.xlu2 %v929_v45 }
 0x282   : > { %v841_v47 = vpop.xlane.xlu1 %840 }
 0x283   : > { %v883_v48 = vsub.f32 %v797_v24, %v841_v47 }
 0x285   : > { %v1963_v49 = vpop.eup %1583  ;;  %v901_v51 = vmul.f32 1.442695, %v883_v48 }
 0x286   : > { %v932_v52 = vsel %vm832_vm4, %v1963_v49, 0.0 }
 0x287   : > { %1585 = vpow2.f32 %v901_v51  ;;  %933 = vadd.xlane.f32.xlu0 %v932_v52  ;;  %861 = vmax.xlane.f32.xlu2 %v860_v50 }
 0x28a   : > { %v844_v54 = vpop.xlane.xlu1 %843 }
 0x28b   : > { %v884_v55 = vsub.f32 %v799_v26, %v844_v54 }
 0x28d   : > { %v1973_v57 = vpop.eup %1585  ;;  %v903_v58 = vmul.f32 1.442695, %v884_v55 }
 0x28e   : > { %v935_v59 = vsel %vm832_vm4, %v1973_v57, 0.0 }
 0x28f   : > { %1587 = vpow2.f32 %v903_v58  ;;  %936 = vadd.xlane.f32.xlu0 %v935_v59  ;;  %864 = vmax.xlane.f32.xlu2 %v863_v56 }
 0x292   : > { %v847_v60 = vpop.xlane.xlu2 %846 }
 0x293   : > { %v885_v61 = vsub.f32 %v802_v28, %v847_v60 }
 0x295   : > { %v1979_v63 = vpop.eup %1587  ;;  %v905_v0 = vmul.f32 1.442695, %v885_v61 }
 0x296   : > { %v938_v2 = vsel %vm832_vm4, %v1979_v63, 0.0 }
 0x297   : > { %1589 = vpow2.f32 %v905_v0  ;;  %939 = vadd.xlane.f32.xlu1 %v938_v2  ;;  %867 = vmax.xlane.f32.xlu0 %v866_v3 }
 0x29a   : > { %v850_v4 = vpop.xlane.xlu2 %849 }
 0x29b   : > { %v886_v5 = vsub.f32 %v804_v30, %v850_v4 }
 0x29d   : > { %v1989_v7 = vpop.eup %1589  ;;  %v907_v8 = vmul.f32 1.442695, %v886_v5 }
 0x29e   : > { %v941_v9 = vsel %vm832_vm4, %v1989_v7, 0.0 }
 0x29f   : > { %1591 = vpow2.f32 %v907_v8  ;;  %942 = vadd.xlane.f32.xlu1 %v941_v9  ;;  %870 = vmax.xlane.f32.xlu0 %v869_v6 }
 0x2a2   : > { %v853_v11 = vpop.xlane.xlu0 %852 }
 0x2a3   : > { %v887_v12 = vsub.f32 %v1945_v32, %v853_v11 }
 0x2a5   : > { %v1996_v13 = vpop.eup %1591  ;;  %v909_v14 = vmul.f32 1.442695, %v887_v12 }
 0x2a6   : > { %v944_v16 = vsel %vm832_vm4, %v1996_v13, 0.0 }
 0x2a7   : > { %1593 = vpow2.f32 %v909_v14  ;;  %873 = vmax.xlane.f32.xlu1 %v872_v15  ;;  %945 = vadd.xlane.f32.xlu2 %v944_v16 }
 0x2aa   : > { %v856_v18 = vpop.xlane.xlu1 %855 }
 0x2ab   : > { %v888_v19 = vsub.f32 %v1949_v34, %v856_v18  ;;  %v1520_v34 = vld [vmem:[#allocation4 + $0x10] sm:$0xff] }
 0x2ac   : > { %1078 = vmatpush.bf16.msra.mxu1 %v1520_v34  ;;  %1534 = vmatpush.bf16.msrb.mxu3 %v1520_v34 }
 0x2ad   : > { %v2007_v21 = vpop.eup %1593  ;;  %v911_v22 = vmul.f32 1.442695, %v888_v19 }
 0x2ae   : > { %v947_v23 = vsel %vm832_vm4, %v2007_v21, 0.0 }
 0x2af   : > { %1595 = vpow2.f32 %v911_v22  ;;  %876 = vmax.xlane.f32.xlu1 %v875_v20  ;;  %948 = vadd.xlane.f32.xlu2 %v947_v23 }
 0x2b0   : > { %1079 = vmatpush.bf16.msra.mxu1 %v1519_v35  ;;  %1535 = vmatpush.bf16.msrb.mxu3 %v1519_v35 }
 0x2b2   : > { %v859_v24 = vpop.xlane.xlu1 %858 }
 0x2b3   : > { %v889_v26 = vsub.f32 %v1953_v36, %v859_v24  ;;  %v1518_v36 = vld [vmem:[#allocation4] sm:$0xff] }
 0x2b4   : > { %1080 = vmatpush.bf16.msra.mxu1 %v1518_v36  ;;  %1536 = vmatpush.bf16.msrb.mxu3 %v1518_v36 }
 0x2b5   : > { %v2014_v27 = vpop.eup %1595  ;;  %v913_v28 = vmul.f32 1.442695, %v889_v26 }
 0x2b6   : > { %v950_v30 = vsel %vm832_vm4, %v2014_v27, 0.0 }
 0x2b7   : > { %1597 = vpow2.f32 %v913_v28  ;;  %879 = vmax.xlane.f32.xlu2 %v878_v29  ;;  %951 = vadd.xlane.f32.xlu0 %v950_v30 }
 0x2bd   : > { %v2020_v31 = vpop.eup %1597 }
 0x2be   : > { %v953_v32 = vsel %vm832_vm4, %v2020_v31, 0.0 }
 0x2bf   : > { %954 = vadd.xlane.f32.xlu0 %v953_v32 }
 0x2f2   : > { %v931_v37 = vpop.xlane.xlu2 %930 }
 0x2f3   : > { %1599 = vrcp.f32 %v931_v37 }
 0x2f9   : > { %v1600_v42 = vpop.eup %1599 }
 0x2fa   : > { %v934_v38 = vpop.xlane.xlu0 %933  ;;  %v862_v39 = vpop.xlane.xlu2 %861  ;;  %v993_v48 = vmul.f32 %v1600_v42, %v1957_v43 }
 0x2fb   : > { %1601 = vrcp.f32 %v934_v38  ;;  %v890_v40 = vsub.f32 %v1961_v46, %v862_v39  ;;  %v1522_v39 = vld [vmem:[%s2200_s3] sm:$0xff] }
 0x2fc   : > { %1174 = vmatpush.bf16.msra.mxu2 %v1522_v39 }
 0x2fd   : > { %v915_v41 = vmul.f32 1.442695, %v890_v40 }
 0x2ff   : > { %1603 = vpow2.f32 %v915_v41 }
 0x301   : > { %v1602_v44 = vpop.eup %1601 }
 0x302   : > { %v937_v45 = vpop.xlane.xlu0 %936  ;;  %v865_v47 = vpop.xlane.xlu2 %864  ;;  %v994_v51 = vmul.f32 %v1602_v44, %v1963_v49 }
 0x303   : > { %v891_v52 = vsub.f32 %v1969_v53, %v865_v47 }
 0x304   : > { %v1009_v50 = vpack.c.bf16 %v994_v51, %v993_v48 }
 0x305   : > { %v2028_v54 = vpop.eup %1603  ;;  %v917_v55 = vmul.f32 1.442695, %v891_v52 }
 0x306   : > { %1481 = vmatmul.msk.bf16.vlgmr.msra.gmra.mxu1 %vm832_vm4, %v1009_v50  ;;  %v956_v46 = vsel %vm832_vm4, %v2028_v54, 0.0 }
 0x307   : > { %1605 = vpow2.f32 %v917_v55  ;;  %957 = vadd.xlane.f32.xlu1 %v956_v46 }
 0x308   : > { %1607 = vrcp.f32 %v937_v45 }
 0x30a   : > { %v940_v56 = vpop.xlane.xlu1 %939  ;;  %v868_v58 = vpop.xlane.xlu0 %867 }
 0x30b   : > { %1609 = vrcp.f32 %v940_v56  ;;  %v892_v43 = vsub.f32 %v1977_v62, %v868_v58 }
 0x30d   : > { %v2034_v49 = vpop.eup %1605  ;;  %v919_v53 = vmul.f32 1.442695, %v892_v43 }
 0x30e   : > { %v959_v59 = vsel %vm832_vm4, %v2034_v49, 0.0  ;;  %v1608_v60 = vpop.eup %1607 }
 0x30f   : > { %1611 = vpow2.f32 %v919_v53  ;;  %960 = vadd.xlane.f32.xlu2 %v959_v59  ;;  %v995_v3 = vmul.f32 %v1608_v60, %v1973_v57 }
 0x311   : > { %v1610_v61 = vpop.eup %1609 }
 0x312   : > { %v943_v0 = vpop.xlane.xlu1 %942  ;;  %v871_v2 = vpop.xlane.xlu0 %870  ;;  %v996_v4 = vmul.f32 %v1610_v61, %v1979_v63 }
 0x313   : > { %v893_v5 = vsub.f32 %v1981_v1, %v871_v2 }
 0x314   : > { %v1010_v6 = vpack.c.bf16 %v996_v4, %v995_v3 }
 0x315   : > { %v2041_v62 = vpop.eup %1611  ;;  %v921_v8 = vmul.f32 1.442695, %v893_v5 }
 0x316   : > { %1482 = vmatmul.msk.bf16.gmra.mxu1 %vm832_vm4, %v1010_v6  ;;  %v962_v9 = vsel %vm832_vm4, %v2041_v62, 0.0 }
 0x317   : > { %1613 = vpow2.f32 %v921_v8  ;;  %963 = vadd.xlane.f32.xlu0 %v962_v9 }
 0x318   : > { %1615 = vrcp.f32 %v943_v0 }
 0x31a   : > { %v874_v11 = vpop.xlane.xlu1 %873  ;;  %v946_v12 = vpop.xlane.xlu2 %945 }
 0x31b   : > { %v894_v57 = vsub.f32 %v1993_v10, %v874_v11  ;;  %1617 = vrcp.f32 %v946_v12 }
 0x31d   : > { %v2047_v63 = vpop.eup %1613  ;;  %v923_v1 = vmul.f32 1.442695, %v894_v57 }
 0x31e   : > { %v965_v14 = vsel %vm832_vm4, %v2047_v63, 0.0  ;;  %v1616_v15 = vpop.eup %1615 }
 0x31f   : > { %1619 = vpow2.f32 %v923_v1  ;;  %966 = vadd.xlane.f32.xlu1 %v965_v14  ;;  %v997_v20 = vmul.f32 %v1616_v15, %v1989_v7 }
 0x321   : > { %v1618_v16 = vpop.eup %1617 }
 0x322   : > { %v877_v18 = vpop.xlane.xlu1 %876  ;;  %v949_v19 = vpop.xlane.xlu2 %948  ;;  %v998_v22 = vmul.f32 %v1618_v16, %v1996_v13 }
 0x323   : > { %v895_v23 = vsub.f32 %v2002_v17, %v877_v18 }
 0x324   : > { %v1011_v10 = vpack.c.bf16 %v998_v22, %v997_v20  ;;  %v2090_v20 = vld [vmem:[%s2201_s4] ss:$0 sm:$0xff] }
 0x325   : > { %v2054_v24 = vpop.eup %1619  ;;  %v925_v26 = vmul.f32 1.442695, %v895_v23  ;;  %v2097_v23 = vstv %s1233_s12 }
 0x326   : > { %1483 = vmatmul.msk.bf16.gmra.mxu1 %vm832_vm4, %v1011_v10  ;;  %v968_v28 = vsel %vm832_vm4, %v2054_v24, 0.0 }
 0x327   : > { %1621 = vpow2.f32 %v925_v26  ;;  %969 = vadd.xlane.f32.xlu2 %v968_v28 }
 0x328   : > { %1623 = vrcp.f32 %v949_v19 }
 0x32a   : > { %v880_v29 = vpop.xlane.xlu2 %879  ;;  %v952_v30 = vpop.xlane.xlu0 %951 }
 0x32b   : > { %v896_v7 = vsub.f32 %v2011_v25, %v880_v29  ;;  %1625 = vrcp.f32 %v952_v30 }
 0x32d   : > { %v2060_v13 = vpop.eup %1621  ;;  %v927_v17 = vmul.f32 1.442695, %v896_v7 }
 0x32e   : > { %v971_v32 = vsel %vm832_vm4, %v2060_v13, 0.0  ;;  %v1624_v33 = vpop.eup %1623 }
 0x32f   : > { %1627 = vpow2.f32 %v927_v17  ;;  %972 = vadd.xlane.f32.xlu0 %v971_v32  ;;  %v999_v35 = vmul.f32 %v1624_v33, %v2007_v21 }
 0x331   : > { %v1626_v34 = vpop.eup %1625 }
 0x332   : > { %v1000_v36 = vmul.f32 %v1626_v34, %v2014_v27  ;;  %v955_v40 = vpop.xlane.xlu0 %954 }
 0x333   : > { %1629 = vrcp.f32 %v955_v40 }
 0x334   : > { %v1012_v37 = vpack.c.bf16 %v1000_v36, %v999_v35 }
 0x335   : > { %v1628_v38 = vpop.eup %1627 }
 0x336   : > { %1484 = vmatmul.msk.bf16.gmra.mxu1 %vm832_vm4, %v1012_v37  ;;  %v974_v25 = vsel %vm832_vm4, %v1628_v38, 0.0  ;;  %v1219_v37 = vld [vmem:[%s2095_s16 + $0x10] sm:$0xff] }
 0x337   : > { %975 = vadd.xlane.f32.xlu1 %v974_v25 }
 0x339   : > { %v1630_v42 = vpop.eup %1629 }
 0x33a   : > { %v1001_v27 = vmul.f32 %v1630_v42, %v2020_v31  ;;  %v1220_v42 = vld [vmem:[%s2095_s16 + $0x18] sm:$0xff] }
 0x37a   : > { %v958_v41 = vpop.xlane.xlu1 %957 }
 0x37b   : > { %1631 = vrcp.f32 %v958_v41 }
 0x381   : > { %v1632_v21 = vpop.eup %1631 }
 0x382   : > { %v1002_v44 = vmul.f32 %v1632_v21, %v2028_v54  ;;  %v961_v48 = vpop.xlane.xlu2 %960 }
 0x383   : > { %v1082_v45 = vpop.f32.mrf.mxu1  ;;  %1633 = vrcp.f32 %v961_v48 }
 0x384   : > { %v1013_v47 = vpack.c.bf16 %v1002_v44, %v1001_v27 }
 0x386   : > { %1485 = vmatmul.msk.bf16.gmra.mxu1 %vm832_vm4, %v1013_v47 }
 0x389   : > { %v1634_v55 = vpop.eup %1633 }
 0x38a   : > { %v964_v51 = vpop.xlane.xlu0 %963  ;;  %v1003_v56 = vmul.f32 %v1634_v55, %v2034_v49 }
 0x38b   : > { %1635 = vrcp.f32 %v964_v51  ;;  %v1084_v52 = vpop.f32.mrf.mxu1  ;;  %v1221_v51 = vld [vmem:[%s2095_s16 + $0x20] sm:$0xff] }
 0x38c   : > { %v1122_v50 = vpack.c.bf16 %v1084_v52, %v1082_v45 }
 0x38e   : > { %1493 = vmatmul.msk.bf16.vlgmr.msra.gmra.mxu2 %vm1142_vm5, %v1122_v50 }
 0x391   : > { %v1636_v46 = vpop.eup %1635 }
 0x392   : > { %v1004_v31 = vmul.f32 %v1636_v46, %v2041_v62  ;;  %v967_v43 = vpop.xlane.xlu1 %966 }
 0x393   : > { %v1087_v54 = vpop.f32.mrf.mxu1  ;;  %1637 = vrcp.f32 %v967_v43 }
 0x394   : > { %v1014_v58 = vpack.c.bf16 %v1004_v31, %v1003_v56  ;;  %v1222_v31 = vld [vmem:[%s2095_s16 + $0x28] sm:$0xff] }
 0x396   : > { %1486 = vmatmul.msk.bf16.gmra.mxu1 %vm832_vm4, %v1014_v58 }
 0x399   : > { %v1638_v61 = vpop.eup %1637 }
 0x39a   : > { %v970_v53 = vpop.xlane.xlu2 %969  ;;  %v1005_v2 = vmul.f32 %v1638_v61, %v2047_v63  ;;  %v1223_v61 = vld [vmem:[%s2095_s16 + $0x30] sm:$0xff] }
 0x39b   : > { %1639 = vrcp.f32 %v970_v53  ;;  %v1089_v59 = vpop.f32.mrf.mxu1 }
 0x39c   : > { %v1123_v60 = vpack.c.bf16 %v1089_v59, %v1087_v54 }
 0x39e   : > { %1494 = vmatmul.msk.bf16.gmra.mxu2 %vm1142_vm5, %v1123_v60 }
 0x3a1   : > { %v1640_v0 = vpop.eup %1639 }
 0x3a2   : > { %v1006_v49 = vmul.f32 %v1640_v0, %v2054_v24  ;;  %v973_v5 = vpop.xlane.xlu0 %972  ;;  %v1217_v24 = vld [vmem:[%s2095_s16] sm:$0xff] }
 0x3a3   : > { %v1092_v3 = vpop.f32.mrf.mxu1  ;;  %1641 = vrcp.f32 %v973_v5 }
 0x3a4   : > { %v1015_v4 = vpack.c.bf16 %v1006_v49, %v1005_v2 }
 0x3a6   : > { %1487 = vmatmul.msk.bf16.gmra.mxu1 %vm832_vm4, %v1015_v4  ;;  %v1224_v4 = vld [vmem:[%s2095_s16 + $0x38] sm:$0xff] }
 0x3a9   : > { %v1642_v9 = vpop.eup %1641 }
 0x3aa   : > { %v976_v6 = vpop.xlane.xlu1 %975  ;;  %v1007_v12 = vmul.f32 %v1642_v9, %v2060_v13  ;;  %v1218_v13 = vld [vmem:[%s2095_s16 + $0x8] sm:$0xff]  ;;  %v1225_v9 = vld [vmem:[%s2095_s16 + $0x40] sm:$0xff] }
 0x3ab   : > { %1643 = vrcp.f32 %v976_v6  ;;  %v1094_v62 = vpop.f32.mrf.mxu1 }
 0x3ac   : > { %v1124_v8 = vpack.c.bf16 %v1094_v62, %v1092_v3 }
 0x3ae   : > { %1495 = vmatmul.msk.bf16.gmra.mxu2 %vm1142_vm5, %v1124_v8 }
 0x3b1   : > { %v1644_v11 = vpop.eup %1643 }
 0x3b2   : > { %v1008_v57 = vmul.f32 %v1644_v11, %v1628_v38 }
 0x3b3   : > { %v1097_v63 = vpop.f32.mrf.mxu1 }
 0x3b4   : > { %v1016_v1 = vpack.c.bf16 %v1008_v57, %v1007_v12 }
 0x3b6   : > { %1488 = vmatmul.msk.bf16.vlgmr.msrb.gmra.mxu3 %vm832_vm4, %v1016_v1  ;;  %v1226_v1 = vld [vmem:[%s2095_s16 + $0x48] sm:$0xff] }
 0x3bb   : > { %v1099_v14 = vpop.f32.mrf.mxu1 }
 0x3bc   : > { %v1125_v15 = vpack.c.bf16 %v1099_v14, %v1097_v63 }
 0x3be   : > { %1496 = vmatmul.msk.bf16.gmra.mxu2 %vm1142_vm5, %v1125_v15 }
 0x403   : > { %v1102_v16 = vpop.f32.mrf.mxu1 }
 0x40b   : > { %v1104_v18 = vpop.f32.mrf.mxu1 }
 0x40c   : > { %v1126_v19 = vpack.c.bf16 %v1104_v18, %v1102_v16 }
 0x40e   : > { %1497 = vmatmul.msk.bf16.gmra.mxu2 %vm1142_vm5, %v1126_v19  ;;  %v1227_v19 = vld [vmem:[%s2095_s16 + $0x50] sm:$0xff] }
 0x411   : > { %v1176_v22 = vpop.f32.mrf.mxu2 }
 0x412   : > { %v1177_v10 = vadd.f32 %v2090_v20, %v1176_v22 }
 0x413   : > { %v1107_v26 = vpop.f32.mrf.mxu1 }
 0x414   : > { %v1235_v28 = vmul.f32 %v2097_v23, %v1177_v10 }
 0x416   : > { %v1251_v29 = vadd.f32 %v1235_v28, %v1217_v24  ;;  %v1228_v28 = vld [vmem:[%s2095_s16 + $0x58] sm:$0xff] }
 0x418   : > { %1268 = vst.msk [vmem:[%s1766_s15] sm:$0xff] %vm1267_vm6, %v1251_v29 }
 0x419   : > { %v1178_v30 = vpop.f32.mrf.mxu2 }
 0x41a   : > { %v1179_v7 = vadd.f32 %v2090_v20, %v1178_v30 }
 0x41b   : > { %v1109_v17 = vpop.f32.mrf.mxu1 }
 0x41c   : > { %v1236_v32 = vmul.f32 %v2097_v23, %v1179_v7  ;;  %v1127_v33 = vpack.c.bf16 %v1109_v17, %v1107_v26  ;;  %v1229_v17 = vld [vmem:[%s2095_s16 + $0x60] sm:$0xff] }
 0x41e   : > { %v1252_v34 = vadd.f32 %v1236_v32, %v1218_v13  ;;  %1498 = vmatmul.msk.bf16.gmra.mxu2 %vm1142_vm5, %v1127_v33 }
 0x420   : > { %1269 = vst.msk [vmem:[%s1766_s15 + $0x8] sm:$0xff] %vm1267_vm6, %v1252_v34 }
 0x421   : > { %v1181_v35 = vpop.f32.mrf.mxu2 }
 0x422   : > { %v1182_v36 = vadd.f32 %v2090_v20, %v1181_v35 }
 0x423   : > { %v1112_v38 = vpop.f32.mrf.mxu1 }
 0x424   : > { %v1237_v25 = vmul.f32 %v2097_v23, %v1182_v36  ;;  %v1230_v36 = vld [vmem:[%s2095_s16 + $0x68] sm:$0xff] }
 0x426   : > { %v1253_v39 = vadd.f32 %v1237_v25, %v1219_v37 }
 0x428   : > { %1270 = vst.msk [vmem:[%s1766_s15 + $0x10] sm:$0xff] %vm1267_vm6, %v1253_v39 }
 0x429   : > { %v1183_v40 = vpop.f32.mrf.mxu2 }
 0x42a   : > { %v1184_v41 = vadd.f32 %v2090_v20, %v1183_v40  ;;  %v1231_v40 = vld [vmem:[%s2095_s16 + $0x70] sm:$0xff] }
 0x42b   : > { %v1114_v21 = vpop.f32.mrf.mxu1 }
 0x42c   : > { %v1238_v27 = vmul.f32 %v2097_v23, %v1184_v41  ;;  %v1128_v44 = vpack.c.bf16 %v1114_v21, %v1112_v38 }
 0x42e   : > { %v1254_v45 = vadd.f32 %v1238_v27, %v1220_v42  ;;  %1499 = vmatmul.msk.bf16.gmra.mxu2 %vm1142_vm5, %v1128_v44  ;;  %v1232_v44 = vld [vmem:[%s2095_s16 + $0x78] sm:$0xff] }
 0x430   : > { %1271 = vst.msk [vmem:[%s1766_s15 + $0x18] sm:$0xff] %vm1267_vm6, %v1254_v45 }
 0x431   : > { %v1186_v47 = vpop.f32.mrf.mxu2 }
 0x432   : > { %v1187_v48 = vadd.f32 %v2090_v20, %v1186_v47 }
 0x434   : > { %v1239_v52 = vmul.f32 %v2097_v23, %v1187_v48 }
 0x436   : > { %v1255_v50 = vadd.f32 %v1239_v52, %v1221_v51 }
 0x438   : > { %1272 = vst.msk [vmem:[%s1766_s15 + $0x20] sm:$0xff] %vm1267_vm6, %v1255_v50 }
 0x439   : > { %v1117_v55 = vpop.f32.mrf.mxu3  ;;  %v1188_v46 = vpop.f32.mrf.mxu2 }
 0x43a   : > { %v1189_v56 = vadd.f32 %v2090_v20, %v1188_v46 }
 0x43c   : > { %v1240_v54 = vmul.f32 %v2097_v23, %v1189_v56 }
 0x43e   : > { %v1256_v58 = vadd.f32 %v1240_v54, %v1222_v31 }
 0x440   : > { %1273 = vst.msk [vmem:[%s1766_s15 + $0x28] sm:$0xff] %vm1267_vm6, %v1256_v58 }
 0x441   : > { %v1119_v43 = vpop.f32.mrf.mxu3  ;;  %v1191_v53 = vpop.f32.mrf.mxu2 }
 0x442   : > { %v1129_v59 = vpack.c.bf16 %v1119_v43, %v1117_v55  ;;  %v1192_v60 = vadd.f32 %v2090_v20, %v1191_v53 }
 0x444   : > { %v1241_v0 = vmul.f32 %v2097_v23, %v1192_v60  ;;  %1500 = vmatmul.msk.bf16.gmra.mxu2 %vm1142_vm5, %v1129_v59 }
 0x446   : > { %v1257_v2 = vadd.f32 %v1241_v0, %v1223_v61 }
 0x448   : > { %1274 = vst.msk [vmem:[%s1766_s15 + $0x30] sm:$0xff] %vm1267_vm6, %v1257_v2 }
 0x449   : > { %v1193_v49 = vpop.f32.mrf.mxu2 }
 0x44a   : > { %v1194_v3 = vadd.f32 %v2090_v20, %v1193_v49 }
 0x44c   : > { %v1242_v5 = vmul.f32 %v2097_v23, %v1194_v3 }
 0x44e   : > { %v1258_v6 = vadd.f32 %v1242_v5, %v1224_v4 }
 0x450   : > { %1275 = vst.msk [vmem:[%s1766_s15 + $0x38] sm:$0xff] %vm1267_vm6, %v1258_v6 }
 0x491   : > { %v1196_v62 = vpop.f32.mrf.mxu2 }
 0x492   : > { %v1197_v8 = vadd.f32 %v2090_v20, %v1196_v62 }
 0x494   : > { %v1243_v11 = vmul.f32 %v2097_v23, %v1197_v8 }
 0x496   : > { %v1259_v12 = vadd.f32 %v1243_v11, %v1225_v9 }
 0x498   : > { %1276 = vst.msk [vmem:[%s1766_s15 + $0x40] sm:$0xff] %vm1267_vm6, %v1259_v12 }
 0x499   : > { %v1198_v57 = vpop.f32.mrf.mxu2 }
 0x49a   : > { %v1199_v63 = vadd.f32 %v2090_v20, %v1198_v57 }
 0x49c   : > { %v1244_v14 = vmul.f32 %v2097_v23, %v1199_v63 }
 0x49e   : > { %v1260_v15 = vadd.f32 %v1244_v14, %v1226_v1 }
 0x4a0   : > { %1277 = vst.msk [vmem:[%s1766_s15 + $0x48] sm:$0xff] %vm1267_vm6, %v1260_v15 }
 0x4a1   : > { %v1201_v16 = vpop.f32.mrf.mxu2 }
 0x4a2   : > { %v1202_v18 = vadd.f32 %v2090_v20, %v1201_v16 }
 0x4a4   : > { %v1245_v22 = vmul.f32 %v2097_v23, %v1202_v18 }
 0x4a6   : > { %v1261_v10 = vadd.f32 %v1245_v22, %v1227_v19 }
 0x4a8   : > { %1278 = vst.msk [vmem:[%s1766_s15 + $0x50] sm:$0xff] %vm1267_vm6, %v1261_v10 }
 0x4a9   : > { %v1203_v24 = vpop.f32.mrf.mxu2 }
 0x4aa   : > { %v1204_v26 = vadd.f32 %v2090_v20, %v1203_v24 }
 0x4ac   : > { %v1246_v29 = vmul.f32 %v2097_v23, %v1204_v26 }
 0x4ae   : > { %v1262_v30 = vadd.f32 %v1246_v29, %v1228_v28 }
 0x4b0   : > { %1279 = vst.msk [vmem:[%s1766_s15 + $0x58] sm:$0xff] %vm1267_vm6, %v1262_v30 }
 0x4b1   : > { %v1206_v7 = vpop.f32.mrf.mxu2 }
 0x4b2   : > { %v1207_v13 = vadd.f32 %v2090_v20, %v1206_v7 }
 0x4b4   : > { %v1247_v32 = vmul.f32 %v2097_v23, %v1207_v13 }
 0x4b6   : > { %v1263_v33 = vadd.f32 %v1247_v32, %v1229_v17 }
 0x4b8   : > { %1280 = vst.msk [vmem:[%s1766_s15 + $0x60] sm:$0xff] %vm1267_vm6, %v1263_v33 }
 0x4b9   : > { %v1208_v34 = vpop.f32.mrf.mxu2 }
 0x4ba   : > { %v1209_v35 = vadd.f32 %v2090_v20, %v1208_v34 }
 0x4bc   : > { %v1248_v37 = vmul.f32 %v2097_v23, %v1209_v35 }
 0x4be   : > { %v1264_v38 = vadd.f32 %v1248_v37, %v1230_v36 }
 0x4c0   : > { %1281 = vst.msk [vmem:[%s1766_s15 + $0x68] sm:$0xff] %vm1267_vm6, %v1264_v38 }
 0x4c7   : > { %v1211_v25 = vpop.f32.mrf.mxu2 }
 0x4c8   : > { %v1212_v39 = vadd.f32 %v2090_v20, %v1211_v25 }
 0x4ca   : > { %v1249_v41 = vmul.f32 %v2097_v23, %v1212_v39 }
 0x4cc   : > { %v1265_v42 = vadd.f32 %v1249_v41, %v1231_v40 }
 0x4ce   : > { %1282 = vst.msk [vmem:[%s1766_s15 + $0x70] sm:$0xff] %vm1267_vm6, %v1265_v42 }
 0x4cf   : > { %v1213_v21 = vpop.f32.mrf.mxu2 }
 0x4d0   : > { %v1214_v27 = vadd.f32 %v2090_v20, %v1213_v21 }
 0x4d2   : > { %v1250_v45 = vmul.f32 %v2097_v23, %v1214_v27 }
 0x4d4   : > { %v1266_v47 = vadd.f32 %v1250_v45, %v1232_v44 }
 0x4d6   : > { %1283 = vst.msk [vmem:[%s1766_s15 + $0x78] sm:$0xff] %vm1267_vm6, %v1266_v47 }
 0x4d7 PF: > { %s17_s27 = sadd.s32 1, %s1683_s27   ;;  %s2204_s23 = smov %s1675_s25 }
 0x4d8   : > { %p14_p8 = scmp.ge.s32.totalorder %s17_s27, 6   ;;  %s2205_s24 = smov %s1679_s26 }
 0x4d9   : > { %s2206_s25 = smov %s2209_s5  ;;  %s2207_s26 = smov %s2213_s28 }
 0x4da   :  { %16 = sbr.rel (!%p14_p8) target bundleno = 3 (0x3), region = 80 }

</bundles_post_ra>
